<compile_context>
chip_gen: v7x
topology: tpu7x:2x2x1
jax: 0.10.0
libtpu: 0.0.40
codegen_flags: <defaults>
</compile_context>

<pallas_src>
import jax
import jax.numpy as jnp
from jax.experimental import pallas as pl
from jax.experimental.pallas import tpu as pltpu


# ----------------------------- Pallas kernel --------------------------------
def _make_local_conv_kernel(channels, kk):
    """Kernel over one (batch, L-tile) block.

    cw_ref, pw_ref : SMEM (1,) scalars (color_weight, position_weight)
    posd_ref       : SMEM (kk,) squared kernel-position distances
    patches_ref    : VMEM (1, C*kk, TL)  scrambled unfold, transport dtype (bf16)
    cdist_ref      : VMEM (1, kk, TL)    per-pixel color distances (f32)
    x_ref          : VMEM (1, C, TL)     original input (flattened spatial, f32)
    o_ref          : VMEM (1, C, TL)     output (f32)
    """
    def kernel(cw_ref, pw_ref, posd_ref, patches_ref, cdist_ref, x_ref, o_ref):
        col_w = cw_ref[0]
        pos_w = pw_ref[0]

        # Per-tap weight rows (1, TL), shared across all channels:
        #   w_p = color_dist[p, :] * color_weight + position_dist[p] * position_weight
        w_rows = []
        for p in range(kk):
            cd_p = cdist_ref[0, pl.ds(p, 1), :]                     # (1, TL) f32
            w_rows.append(cd_p * col_w + posd_ref[p] * pos_w)

        # Unrolled per-tap multiply-accumulate (pure VPU, f32 accumulator),
        # one lane-dense output row per channel.
        for c in range(channels):
            tap = patches_ref[0, pl.ds(c * kk, 1), :].astype(jnp.float32)
            acc = tap * w_rows[0]
            for p in range(1, kk):
                tap = patches_ref[0, pl.ds(c * kk + p, 1), :].astype(jnp.float32)
                acc = acc + tap * w_rows[p]
            o_ref[0, pl.ds(c, 1), :] = acc * x_ref[0, pl.ds(c, 1), :]

    return kernel


# ------------------------------ wrapper --------------------------------------
def _pick_spatial_tile(L, target):
    """Largest multiple of 128 that divides L and is <= target, else full L."""
    if L % 128 != 0:
        return L                       # full-extent block (allowed by the (8,128) rule)
    best = 128
    m = 128
    while m <= min(L, target):
        if L % m == 0:
            best = m
        m += 128
    return best


def conv2d_local_forward(x, color_distance, position_distances,
                         color_weight, position_weight,
                         kernel_size, in_height, in_width,
                         *, transport_dtype=jnp.bfloat16, spatial_tile_target=1024):
    B, C, H, W = x.shape
    kh, kw = kernel_size
    kk = kh * kw

    # torch F.pad(pad=(top,bottom,left,right)) pads the LAST dim (W) with (top,bottom)
    # and the H dim with (left,right) -- reproduce exactly.
    top, bottom = kh // 2, (kh - 1) // 2
    left, right = kw // 2, (kw - 1) // 2
    padded = jnp.pad(x, ((0, 0), (0, 0), (left, right), (top, bottom)))
    Hp, Wp = padded.shape[2], padded.shape[3]
    out_h, out_w = Hp - kh + 1, Wp - kw + 1
    L = out_h * out_w
    assert L == in_height * in_width, "the module's .view requires L == in_height*in_width"

    # bf16 transport of the dominant array; the math stays f32 in-kernel.
    padded_t = padded.astype(transport_dtype)

    # Build the *transposed* unfold directly:
    #   V[b, l, c*kk + i*kw + j] = padded[b, c, y+i, x+j]   (l = y*out_w + x)
    # The module's permute(0,2,1).reshape(B,C,kk,L) is then a pure flat
    # reinterpretation of V (same row-major buffer), so the reshape below is a
    # bitcast — no second full-size HBM transpose pass over the kk-x array.
    cols = []
    for c in range(C):
        for i in range(kh):
            for j in range(kw):
                cols.append(padded_t[:, c, i:i + out_h, j:j + out_w].reshape(B, L))
    v = jnp.stack(cols, axis=-1)                       # (B, L, C*kk) == unfold.permute(0,2,1)
    patches = v.reshape(B, C * kk, L)                  # scrambled data in kernel layout

    # Small arrays / scalars.
    cdist_t = jnp.transpose(color_distance, (0, 2, 1)).astype(jnp.float32)   # (B, kk, L)
    x_flat = x.reshape(B, C, H * W).astype(jnp.float32)
    posd = position_distances.reshape(-1).astype(jnp.float32)                # (kk,) -> SMEM
    cw = jnp.reshape(color_weight, (1,)).astype(jnp.float32)                 # SMEM scalar
    pw = jnp.reshape(position_weight, (1,)).astype(jnp.float32)              # SMEM scalar

    tl = _pick_spatial_tile(L, spatial_tile_target)
    grid = (B, L // tl)

    out_flat = pl.pallas_call(
        _make_local_conv_kernel(C, kk),
        out_shape=jax.ShapeDtypeStruct((B, C, L), jnp.float32),
        grid=grid,
        in_specs=[
            pl.BlockSpec(memory_space=pltpu.MemorySpace.SMEM),             # color_weight
            pl.BlockSpec(memory_space=pltpu.MemorySpace.SMEM),             # position_weight
            pl.BlockSpec(memory_space=pltpu.MemorySpace.SMEM),             # position distances
            pl.BlockSpec((1, C * kk, tl), lambda b, t: (b, 0, t)),         # scrambled patches (bf16)
            pl.BlockSpec((1, kk, tl), lambda b, t: (b, 0, t)),             # color distances
            pl.BlockSpec((1, C, tl), lambda b, t: (b, 0, t)),              # input
        ],
        out_specs=pl.BlockSpec((1, C, tl), lambda b, t: (b, 0, t)),
        compiler_params=pltpu.CompilerParams(
            dimension_semantics=("parallel", "parallel"),
            vmem_limit_bytes=48 * 1024 * 1024,     # leaves headroom on v7x's 64 MiB VMEM
        ),
    )(cw, pw, posd, patches, cdist_t, x_flat)

    return out_flat.reshape(B, C, in_height, in_width)


# -------------------------- pure-JAX reference --------------------------------
def conv2d_local_reference(x, color_distance, position_distances,
                           color_weight, position_weight, kernel_size,
                           patch_dtype=jnp.float32):
    """Direct transcription of the PyTorch forward (including its index scramble).

    `patch_dtype` emulates the kernel's bf16 transport of the unfolded patches
    for a bit-matched comparison; pass jnp.float32 for the exact original numerics.
    """
    B, C, H, W = x.shape
    kh, kw = kernel_size
    kk = kh * kw
    top, bottom = kh // 2, (kh - 1) // 2
    left, right = kw // 2, (kw - 1) // 2
    padded = jnp.pad(x, ((0, 0), (0, 0), (left, right), (top, bottom)))
    padded = padded.astype(patch_dtype).astype(jnp.float32)
    Hp, Wp = padded.shape[2], padded.shape[3]
    out_h, out_w = Hp - kh + 1, Wp - kw + 1
    patches = []
    for i in range(kh):
        for j in range(kw):
            patches.append(padded[:, :, i:i + out_h, j:j + out_w])
    unfolded = jnp.stack(patches, axis=2).reshape(B, C * kk, out_h * out_w)
    u = jnp.transpose(unfolded, (0, 2, 1)).reshape(B, C, kk, -1)
    u = jnp.transpose(u, (0, 1, 3, 2))                                   # (B, C, L, kk)
    weights = position_distances * position_weight + color_distance * color_weight
    weights = weights[:, None, :, :]                                     # (B, 1, L, kk)
    out = jnp.sum(u * weights, axis=-1).reshape(B, C, H, W)
    return out * x


# --------------------------------- main ---------------------------------------
if __name__ == "__main__":
    B, C, H, W = 2, 4, 16, 16
    kernel_size = (3, 3)
    kh, kw = kernel_size
    kk = kh * kw

    # position_distances buffer, exactly as in Conv2dLocal.__init__
    height_pos = jnp.arange(kh).reshape(1, -1)
    width_pos = jnp.arange(kw).reshape(1, -1)
    height_distance = (height_pos - kh // 2) ** 2
    width_distance = (width_pos - kw // 2) ** 2
    position_distances = (height_distance + width_distance.T).reshape(-1).astype(jnp.float32)

    # deterministic parameter init (uniform(-0.005, 0.005), as reset_parameters)
    key = jax.random.PRNGKey(0)
    k1, k2, k3, k4 = jax.random.split(key, 4)
    position_weight = jax.random.uniform(k1, (1,), minval=-0.005, maxval=0.005, dtype=jnp.float32)
    color_weight = jax.random.uniform(k2, (1,), minval=-0.005, maxval=0.005, dtype=jnp.float32)

    # inputs
    x = jax.random.normal(k3, (B, C, H, W), dtype=jnp.float32)
    color_distance = jax.random.uniform(k4, (B, H * W, kk), dtype=jnp.float32)

    # spatial_tile_target=128 exercises the (batch, L-tile) grid even at this small size;
    # real workloads use the default (1024-lane tiles).
    out = conv2d_local_forward(x, color_distance, position_distances,
                               color_weight, position_weight,
                               kernel_size, H, W, spatial_tile_target=128)
    out = jax.block_until_ready(out)

    # Bit-matched reference (same bf16 quantization of the patches, f32 math).
    ref_matched = conv2d_local_reference(x, color_distance, position_distances,
                                         color_weight, position_weight, kernel_size,
                                         patch_dtype=jnp.bfloat16)
    # Exact f32 reference (original module numerics).
    ref_exact = conv2d_local_reference(x, color_distance, position_distances,
                                       color_weight, position_weight, kernel_size,
                                       patch_dtype=jnp.float32)
    ref_matched = jax.block_until_ready(ref_matched)
    ref_exact = jax.block_until_ready(ref_exact)

    assert out.shape == (B, C, H, W)
    assert jnp.allclose(out, ref_matched, rtol=1e-5, atol=5e-6), "mismatch vs bit-matched reference"
    assert jnp.allclose(out, ref_exact, rtol=5e-2, atol=5e-2), "bf16 transport drifted from f32 reference"
    print("KERNEL_OK")
</pallas_src>

<mosaic_0001>
module attributes {stable_mosaic.version = 11 : i64} {
  func.func @kernel(%arg0: i32, %arg1: i32, %arg2: memref<1xf32, #tpu.memory_space<smem>>, %arg3: memref<1xf32, #tpu.memory_space<smem>>, %arg4: memref<9xf32, #tpu.memory_space<smem>>, %arg5: memref<1x36x128xbf16, #tpu.memory_space<vmem>>, %arg6: memref<1x9x128xf32, #tpu.memory_space<vmem>>, %arg7: memref<1x4x128xf32, #tpu.memory_space<vmem>>, %arg8: memref<1x4x128xf32, #tpu.memory_space<vmem>>) attributes {dimension_semantics = [#tpu.dimension_semantics<parallel>, #tpu.dimension_semantics<parallel>], iteration_bounds = array<i64: 2, 2>, scalar_prefetch = 0 : i64, scratch_operands = 0 : i64, tpu.core_type = #tpu.core_type<tc>, window_params = [{transform_indices = @transform_0, window_bounds = array<i64: 1>}, {transform_indices = @transform_1, window_bounds = array<i64: 1>}, {transform_indices = @transform_2, window_bounds = array<i64: 9>}, {transform_indices = @transform_3, window_bounds = array<i64: 1, 36, 128>}, {transform_indices = @transform_4, window_bounds = array<i64: 1, 9, 128>}, {transform_indices = @transform_5, window_bounds = array<i64: 1, 4, 128>}, {transform_indices = @transform_6, window_bounds = array<i64: 1, 4, 128>}]} {
    %c0 = arith.constant 0 : index
    %0 = memref.load %arg2[%c0] : memref<1xf32, #tpu.memory_space<smem>>
    %c0_0 = arith.constant 0 : index
    %1 = memref.load %arg3[%c0_0] : memref<1xf32, #tpu.memory_space<smem>>
    %c0_1 = arith.constant 0 : index
    %c0_2 = arith.constant 0 : index
    %c0_3 = arith.constant 0 : index
    %2 = vector.load %arg6[%c0_1, %c0_2, %c0_3] : memref<1x9x128xf32, #tpu.memory_space<vmem>>, vector<1x1x128xf32>
    %3 = vector.shape_cast %2 : vector<1x1x128xf32> to vector<1x128xf32>
    %4 = vector.broadcast %0 : f32 to vector<1x128xf32>
    %5 = arith.mulf %3, %4 : vector<1x128xf32>
    %c0_4 = arith.constant 0 : index
    %6 = memref.load %arg4[%c0_4] : memref<9xf32, #tpu.memory_space<smem>>
    %7 = arith.mulf %6, %1 : f32
    %8 = vector.broadcast %7 : f32 to vector<1x128xf32>
    %9 = arith.addf %5, %8 : vector<1x128xf32>
    %c0_5 = arith.constant 0 : index
    %c1 = arith.constant 1 : index
    %c0_6 = arith.constant 0 : index
    %10 = vector.load %arg6[%c0_5, %c1, %c0_6] : memref<1x9x128xf32, #tpu.memory_space<vmem>>, vector<1x1x128xf32>
    %11 = vector.shape_cast %10 : vector<1x1x128xf32> to vector<1x128xf32>
    %12 = vector.broadcast %0 : f32 to vector<1x128xf32>
    %13 = arith.mulf %11, %12 : vector<1x128xf32>
    %c1_7 = arith.constant 1 : index
    %14 = memref.load %arg4[%c1_7] : memref<9xf32, #tpu.memory_space<smem>>
    %15 = arith.mulf %14, %1 : f32
    %16 = vector.broadcast %15 : f32 to vector<1x128xf32>
    %17 = arith.addf %13, %16 : vector<1x128xf32>
    %c0_8 = arith.constant 0 : index
    %c2 = arith.constant 2 : index
    %c0_9 = arith.constant 0 : index
    %18 = vector.load %arg6[%c0_8, %c2, %c0_9] : memref<1x9x128xf32, #tpu.memory_space<vmem>>, vector<1x1x128xf32>
    %19 = vector.shape_cast %18 : vector<1x1x128xf32> to vector<1x128xf32>
    %20 = vector.broadcast %0 : f32 to vector<1x128xf32>
    %21 = arith.mulf %19, %20 : vector<1x128xf32>
    %c2_10 = arith.constant 2 : index
    %22 = memref.load %arg4[%c2_10] : memref<9xf32, #tpu.memory_space<smem>>
    %23 = arith.mulf %22, %1 : f32
    %24 = vector.broadcast %23 : f32 to vector<1x128xf32>
    %25 = arith.addf %21, %24 : vector<1x128xf32>
    %c0_11 = arith.constant 0 : index
    %c3 = arith.constant 3 : index
    %c0_12 = arith.constant 0 : index
    %26 = vector.load %arg6[%c0_11, %c3, %c0_12] : memref<1x9x128xf32, #tpu.memory_space<vmem>>, vector<1x1x128xf32>
    %27 = vector.shape_cast %26 : vector<1x1x128xf32> to vector<1x128xf32>
    %28 = vector.broadcast %0 : f32 to vector<1x128xf32>
    %29 = arith.mulf %27, %28 : vector<1x128xf32>
    %c3_13 = arith.constant 3 : index
    %30 = memref.load %arg4[%c3_13] : memref<9xf32, #tpu.memory_space<smem>>
    %31 = arith.mulf %30, %1 : f32
    %32 = vector.broadcast %31 : f32 to vector<1x128xf32>
    %33 = arith.addf %29, %32 : vector<1x128xf32>
    %c0_14 = arith.constant 0 : index
    %c4 = arith.constant 4 : index
    %c0_15 = arith.constant 0 : index
    %34 = vector.load %arg6[%c0_14, %c4, %c0_15] : memref<1x9x128xf32, #tpu.memory_space<vmem>>, vector<1x1x128xf32>
    %35 = vector.shape_cast %34 : vector<1x1x128xf32> to vector<1x128xf32>
    %36 = vector.broadcast %0 : f32 to vector<1x128xf32>
    %37 = arith.mulf %35, %36 : vector<1x128xf32>
    %c4_16 = arith.constant 4 : index
    %38 = memref.load %arg4[%c4_16] : memref<9xf32, #tpu.memory_space<smem>>
    %39 = arith.mulf %38, %1 : f32
    %40 = vector.broadcast %39 : f32 to vector<1x128xf32>
    %41 = arith.addf %37, %40 : vector<1x128xf32>
    %c0_17 = arith.constant 0 : index
    %c5 = arith.constant 5 : index
    %c0_18 = arith.constant 0 : index
    %42 = vector.load %arg6[%c0_17, %c5, %c0_18] : memref<1x9x128xf32, #tpu.memory_space<vmem>>, vector<1x1x128xf32>
    %43 = vector.shape_cast %42 : vector<1x1x128xf32> to vector<1x128xf32>
    %44 = vector.broadcast %0 : f32 to vector<1x128xf32>
    %45 = arith.mulf %43, %44 : vector<1x128xf32>
    %c5_19 = arith.constant 5 : index
    %46 = memref.load %arg4[%c5_19] : memref<9xf32, #tpu.memory_space<smem>>
    %47 = arith.mulf %46, %1 : f32
    %48 = vector.broadcast %47 : f32 to vector<1x128xf32>
    %49 = arith.addf %45, %48 : vector<1x128xf32>
    %c0_20 = arith.constant 0 : index
    %c6 = arith.constant 6 : index
    %c0_21 = arith.constant 0 : index
    %50 = vector.load %arg6[%c0_20, %c6, %c0_21] : memref<1x9x128xf32, #tpu.memory_space<vmem>>, vector<1x1x128xf32>
    %51 = vector.shape_cast %50 : vector<1x1x128xf32> to vector<1x128xf32>
    %52 = vector.broadcast %0 : f32 to vector<1x128xf32>
    %53 = arith.mulf %51, %52 : vector<1x128xf32>
    %c6_22 = arith.constant 6 : index
    %54 = memref.load %arg4[%c6_22] : memref<9xf32, #tpu.memory_space<smem>>
    %55 = arith.mulf %54, %1 : f32
    %56 = vector.broadcast %55 : f32 to vector<1x128xf32>
    %57 = arith.addf %53, %56 : vector<1x128xf32>
    %c0_23 = arith.constant 0 : index
    %c7 = arith.constant 7 : index
    %c0_24 = arith.constant 0 : index
    %58 = vector.load %arg6[%c0_23, %c7, %c0_24] : memref<1x9x128xf32, #tpu.memory_space<vmem>>, vector<1x1x128xf32>
    %59 = vector.shape_cast %58 : vector<1x1x128xf32> to vector<1x128xf32>
    %60 = vector.broadcast %0 : f32 to vector<1x128xf32>
    %61 = arith.mulf %59, %60 : vector<1x128xf32>
    %c7_25 = arith.constant 7 : index
    %62 = memref.load %arg4[%c7_25] : memref<9xf32, #tpu.memory_space<smem>>
    %63 = arith.mulf %62, %1 : f32
    %64 = vector.broadcast %63 : f32 to vector<1x128xf32>
    %65 = arith.addf %61, %64 : vector<1x128xf32>
    %c0_26 = arith.constant 0 : index
    %c8 = arith.constant 8 : index
    %c0_27 = arith.constant 0 : index
    %66 = vector.load %arg6[%c0_26, %c8, %c0_27] : memref<1x9x128xf32, #tpu.memory_space<vmem>>, vector<1x1x128xf32>
    %67 = vector.shape_cast %66 : vector<1x1x128xf32> to vector<1x128xf32>
    %68 = vector.broadcast %0 : f32 to vector<1x128xf32>
    %69 = arith.mulf %67, %68 : vector<1x128xf32>
    %c8_28 = arith.constant 8 : index
    %70 = memref.load %arg4[%c8_28] : memref<9xf32, #tpu.memory_space<smem>>
    %71 = arith.mulf %70, %1 : f32
    %72 = vector.broadcast %71 : f32 to vector<1x128xf32>
    %73 = arith.addf %69, %72 : vector<1x128xf32>
    %c0_29 = arith.constant 0 : index
    %c0_30 = arith.constant 0 : index
    %c0_31 = arith.constant 0 : index
    %74 = vector.load %arg5[%c0_29, %c0_30, %c0_31] : memref<1x36x128xbf16, #tpu.memory_space<vmem>>, vector<1x1x128xbf16>
    %75 = vector.shape_cast %74 : vector<1x1x128xbf16> to vector<1x128xbf16>
    %76 = arith.extf %75 : vector<1x128xbf16> to vector<1x128xf32>
    %77 = arith.mulf %76, %9 : vector<1x128xf32>
    %c0_32 = arith.constant 0 : index
    %c1_33 = arith.constant 1 : index
    %c0_34 = arith.constant 0 : index
    %78 = vector.load %arg5[%c0_32, %c1_33, %c0_34] : memref<1x36x128xbf16, #tpu.memory_space<vmem>>, vector<1x1x128xbf16>
    %79 = vector.shape_cast %78 : vector<1x1x128xbf16> to vector<1x128xbf16>
    %80 = arith.extf %79 : vector<1x128xbf16> to vector<1x128xf32>
    %81 = arith.mulf %80, %17 : vector<1x128xf32>
    %82 = arith.addf %77, %81 : vector<1x128xf32>
    %c0_35 = arith.constant 0 : index
    %c2_36 = arith.constant 2 : index
    %c0_37 = arith.constant 0 : index
    %83 = vector.load %arg5[%c0_35, %c2_36, %c0_37] : memref<1x36x128xbf16, #tpu.memory_space<vmem>>, vector<1x1x128xbf16>
    %84 = vector.shape_cast %83 : vector<1x1x128xbf16> to vector<1x128xbf16>
    %85 = arith.extf %84 : vector<1x128xbf16> to vector<1x128xf32>
    %86 = arith.mulf %85, %25 : vector<1x128xf32>
    %87 = arith.addf %82, %86 : vector<1x128xf32>
    %c0_38 = arith.constant 0 : index
    %c3_39 = arith.constant 3 : index
    %c0_40 = arith.constant 0 : index
    %88 = vector.load %arg5[%c0_38, %c3_39, %c0_40] : memref<1x36x128xbf16, #tpu.memory_space<vmem>>, vector<1x1x128xbf16>
    %89 = vector.shape_cast %88 : vector<1x1x128xbf16> to vector<1x128xbf16>
    %90 = arith.extf %89 : vector<1x128xbf16> to vector<1x128xf32>
    %91 = arith.mulf %90, %33 : vector<1x128xf32>
    %92 = arith.addf %87, %91 : vector<1x128xf32>
    %c0_41 = arith.constant 0 : index
    %c4_42 = arith.constant 4 : index
    %c0_43 = arith.constant 0 : index
    %93 = vector.load %arg5[%c0_41, %c4_42, %c0_43] : memref<1x36x128xbf16, #tpu.memory_space<vmem>>, vector<1x1x128xbf16>
    %94 = vector.shape_cast %93 : vector<1x1x128xbf16> to vector<1x128xbf16>
    %95 = arith.extf %94 : vector<1x128xbf16> to vector<1x128xf32>
    %96 = arith.mulf %95, %41 : vector<1x128xf32>
    %97 = arith.addf %92, %96 : vector<1x128xf32>
    %c0_44 = arith.constant 0 : index
    %c5_45 = arith.constant 5 : index
    %c0_46 = arith.constant 0 : index
    %98 = vector.load %arg5[%c0_44, %c5_45, %c0_46] : memref<1x36x128xbf16, #tpu.memory_space<vmem>>, vector<1x1x128xbf16>
    %99 = vector.shape_cast %98 : vector<1x1x128xbf16> to vector<1x128xbf16>
    %100 = arith.extf %99 : vector<1x128xbf16> to vector<1x128xf32>
    %101 = arith.mulf %100, %49 : vector<1x128xf32>
    %102 = arith.addf %97, %101 : vector<1x128xf32>
    %c0_47 = arith.constant 0 : index
    %c6_48 = arith.constant 6 : index
    %c0_49 = arith.constant 0 : index
    %103 = vector.load %arg5[%c0_47, %c6_48, %c0_49] : memref<1x36x128xbf16, #tpu.memory_space<vmem>>, vector<1x1x128xbf16>
    %104 = vector.shape_cast %103 : vector<1x1x128xbf16> to vector<1x128xbf16>
    %105 = arith.extf %104 : vector<1x128xbf16> to vector<1x128xf32>
    %106 = arith.mulf %105, %57 : vector<1x128xf32>
    %107 = arith.addf %102, %106 : vector<1x128xf32>
    %c0_50 = arith.constant 0 : index
    %c7_51 = arith.constant 7 : index
    %c0_52 = arith.constant 0 : index
    %108 = vector.load %arg5[%c0_50, %c7_51, %c0_52] : memref<1x36x128xbf16, #tpu.memory_space<vmem>>, vector<1x1x128xbf16>
    %109 = vector.shape_cast %108 : vector<1x1x128xbf16> to vector<1x128xbf16>
    %110 = arith.extf %109 : vector<1x128xbf16> to vector<1x128xf32>
    %111 = arith.mulf %110, %65 : vector<1x128xf32>
    %112 = arith.addf %107, %111 : vector<1x128xf32>
    %c0_53 = arith.constant 0 : index
    %c8_54 = arith.constant 8 : index
    %c0_55 = arith.constant 0 : index
    %113 = vector.load %arg5[%c0_53, %c8_54, %c0_55] : memref<1x36x128xbf16, #tpu.memory_space<vmem>>, vector<1x1x128xbf16>
    %114 = vector.shape_cast %113 : vector<1x1x128xbf16> to vector<1x128xbf16>
    %115 = arith.extf %114 : vector<1x128xbf16> to vector<1x128xf32>
    %116 = arith.mulf %115, %73 : vector<1x128xf32>
    %117 = arith.addf %112, %116 : vector<1x128xf32>
    %c0_56 = arith.constant 0 : index
    %c0_57 = arith.constant 0 : index
    %c0_58 = arith.constant 0 : index
    %118 = vector.load %arg7[%c0_56, %c0_57, %c0_58] : memref<1x4x128xf32, #tpu.memory_space<vmem>>, vector<1x1x128xf32>
    %119 = vector.shape_cast %118 : vector<1x1x128xf32> to vector<1x128xf32>
    %120 = arith.mulf %117, %119 : vector<1x128xf32>
    %c0_59 = arith.constant 0 : index
    %c0_60 = arith.constant 0 : index
    %c0_61 = arith.constant 0 : index
    %121 = vector.load %arg8[%c0_59, %c0_60, %c0_61] : memref<1x4x128xf32, #tpu.memory_space<vmem>>, vector<1x1x128xf32>
    %122 = vector.shape_cast %121 : vector<1x1x128xf32> to vector<1x128xf32>
    %123 = vector.shape_cast %120 : vector<1x128xf32> to vector<1x1x128xf32>
    tpu.vector_store %arg8[%c0_59, %c0_60, %c0_61], %123 {strides = array<i32>} : memref<1x4x128xf32, #tpu.memory_space<vmem>>, vector<1x1x128xf32>,
    %c0_62 = arith.constant 0 : index
    %c9 = arith.constant 9 : index
    %c0_63 = arith.constant 0 : index
    %124 = vector.load %arg5[%c0_62, %c9, %c0_63] : memref<1x36x128xbf16, #tpu.memory_space<vmem>>, vector<1x1x128xbf16>
    %125 = vector.shape_cast %124 : vector<1x1x128xbf16> to vector<1x128xbf16>
    %126 = arith.extf %125 : vector<1x128xbf16> to vector<1x128xf32>
    %127 = arith.mulf %126, %9 : vector<1x128xf32>
    %c0_64 = arith.constant 0 : index
    %c10 = arith.constant 10 : index
    %c0_65 = arith.constant 0 : index
    %128 = vector.load %arg5[%c0_64, %c10, %c0_65] : memref<1x36x128xbf16, #tpu.memory_space<vmem>>, vector<1x1x128xbf16>
    %129 = vector.shape_cast %128 : vector<1x1x128xbf16> to vector<1x128xbf16>
    %130 = arith.extf %129 : vector<1x128xbf16> to vector<1x128xf32>
    %131 = arith.mulf %130, %17 : vector<1x128xf32>
    %132 = arith.addf %127, %131 : vector<1x128xf32>
    %c0_66 = arith.constant 0 : index
    %c11 = arith.constant 11 : index
    %c0_67 = arith.constant 0 : index
    %133 = vector.load %arg5[%c0_66, %c11, %c0_67] : memref<1x36x128xbf16, #tpu.memory_space<vmem>>, vector<1x1x128xbf16>
    %134 = vector.shape_cast %133 : vector<1x1x128xbf16> to vector<1x128xbf16>
    %135 = arith.extf %134 : vector<1x128xbf16> to vector<1x128xf32>
    %136 = arith.mulf %135, %25 : vector<1x128xf32>
    %137 = arith.addf %132, %136 : vector<1x128xf32>
    %c0_68 = arith.constant 0 : index
    %c12 = arith.constant 12 : index
    %c0_69 = arith.constant 0 : index
    %138 = vector.load %arg5[%c0_68, %c12, %c0_69] : memref<1x36x128xbf16, #tpu.memory_space<vmem>>, vector<1x1x128xbf16>
    %139 = vector.shape_cast %138 : vector<1x1x128xbf16> to vector<1x128xbf16>
    %140 = arith.extf %139 : vector<1x128xbf16> to vector<1x128xf32>
    %141 = arith.mulf %140, %33 : vector<1x128xf32>
    %142 = arith.addf %137, %141 : vector<1x128xf32>
    %c0_70 = arith.constant 0 : index
    %c13 = arith.constant 13 : index
    %c0_71 = arith.constant 0 : index
    %143 = vector.load %arg5[%c0_70, %c13, %c0_71] : memref<1x36x128xbf16, #tpu.memory_space<vmem>>, vector<1x1x128xbf16>
    %144 = vector.shape_cast %143 : vector<1x1x128xbf16> to vector<1x128xbf16>
    %145 = arith.extf %144 : vector<1x128xbf16> to vector<1x128xf32>
    %146 = arith.mulf %145, %41 : vector<1x128xf32>
    %147 = arith.addf %142, %146 : vector<1x128xf32>
    %c0_72 = arith.constant 0 : index
    %c14 = arith.constant 14 : index
    %c0_73 = arith.constant 0 : index
    %148 = vector.load %arg5[%c0_72, %c14, %c0_73] : memref<1x36x128xbf16, #tpu.memory_space<vmem>>, vector<1x1x128xbf16>
    %149 = vector.shape_cast %148 : vector<1x1x128xbf16> to vector<1x128xbf16>
    %150 = arith.extf %149 : vector<1x128xbf16> to vector<1x128xf32>
    %151 = arith.mulf %150, %49 : vector<1x128xf32>
    %152 = arith.addf %147, %151 : vector<1x128xf32>
    %c0_74 = arith.constant 0 : index
    %c15 = arith.constant 15 : index
    %c0_75 = arith.constant 0 : index
    %153 = vector.load %arg5[%c0_74, %c15, %c0_75] : memref<1x36x128xbf16, #tpu.memory_space<vmem>>, vector<1x1x128xbf16>
    %154 = vector.shape_cast %153 : vector<1x1x128xbf16> to vector<1x128xbf16>
    %155 = arith.extf %154 : vector<1x128xbf16> to vector<1x128xf32>
    %156 = arith.mulf %155, %57 : vector<1x128xf32>
    %157 = arith.addf %152, %156 : vector<1x128xf32>
    %c0_76 = arith.constant 0 : index
    %c16 = arith.constant 16 : index
    %c0_77 = arith.constant 0 : index
    %158 = vector.load %arg5[%c0_76, %c16, %c0_77] : memref<1x36x128xbf16, #tpu.memory_space<vmem>>, vector<1x1x128xbf16>
    %159 = vector.shape_cast %158 : vector<1x1x128xbf16> to vector<1x128xbf16>
    %160 = arith.extf %159 : vector<1x128xbf16> to vector<1x128xf32>
    %161 = arith.mulf %160, %65 : vector<1x128xf32>
    %162 = arith.addf %157, %161 : vector<1x128xf32>
    %c0_78 = arith.constant 0 : index
    %c17 = arith.constant 17 : index
    %c0_79 = arith.constant 0 : index
    %163 = vector.load %arg5[%c0_78, %c17, %c0_79] : memref<1x36x128xbf16, #tpu.memory_space<vmem>>, vector<1x1x128xbf16>
    %164 = vector.shape_cast %163 : vector<1x1x128xbf16> to vector<1x128xbf16>
    %165 = arith.extf %164 : vector<1x128xbf16> to vector<1x128xf32>
    %166 = arith.mulf %165, %73 : vector<1x128xf32>
    %167 = arith.addf %162, %166 : vector<1x128xf32>
    %c0_80 = arith.constant 0 : index
    %c1_81 = arith.constant 1 : index
    %c0_82 = arith.constant 0 : index
    %168 = vector.load %arg7[%c0_80, %c1_81, %c0_82] : memref<1x4x128xf32, #tpu.memory_space<vmem>>, vector<1x1x128xf32>
    %169 = vector.shape_cast %168 : vector<1x1x128xf32> to vector<1x128xf32>
    %170 = arith.mulf %167, %169 : vector<1x128xf32>
    %c0_83 = arith.constant 0 : index
    %c1_84 = arith.constant 1 : index
    %c0_85 = arith.constant 0 : index
    %171 = vector.load %arg8[%c0_83, %c1_84, %c0_85] : memref<1x4x128xf32, #tpu.memory_space<vmem>>, vector<1x1x128xf32>
    %172 = vector.shape_cast %171 : vector<1x1x128xf32> to vector<1x128xf32>
    %173 = vector.shape_cast %170 : vector<1x128xf32> to vector<1x1x128xf32>
    tpu.vector_store %arg8[%c0_83, %c1_84, %c0_85], %173 {strides = array<i32>} : memref<1x4x128xf32, #tpu.memory_space<vmem>>, vector<1x1x128xf32>,
    %c0_86 = arith.constant 0 : index
    %c18 = arith.constant 18 : index
    %c0_87 = arith.constant 0 : index
    %174 = vector.load %arg5[%c0_86, %c18, %c0_87] : memref<1x36x128xbf16, #tpu.memory_space<vmem>>, vector<1x1x128xbf16>
    %175 = vector.shape_cast %174 : vector<1x1x128xbf16> to vector<1x128xbf16>
    %176 = arith.extf %175 : vector<1x128xbf16> to vector<1x128xf32>
    %177 = arith.mulf %176, %9 : vector<1x128xf32>
    %c0_88 = arith.constant 0 : index
    %c19 = arith.constant 19 : index
    %c0_89 = arith.constant 0 : index
    %178 = vector.load %arg5[%c0_88, %c19, %c0_89] : memref<1x36x128xbf16, #tpu.memory_space<vmem>>, vector<1x1x128xbf16>
    %179 = vector.shape_cast %178 : vector<1x1x128xbf16> to vector<1x128xbf16>
    %180 = arith.extf %179 : vector<1x128xbf16> to vector<1x128xf32>
    %181 = arith.mulf %180, %17 : vector<1x128xf32>
    %182 = arith.addf %177, %181 : vector<1x128xf32>
    %c0_90 = arith.constant 0 : index
    %c20 = arith.constant 20 : index
    %c0_91 = arith.constant 0 : index
    %183 = vector.load %arg5[%c0_90, %c20, %c0_91] : memref<1x36x128xbf16, #tpu.memory_space<vmem>>, vector<1x1x128xbf16>
    %184 = vector.shape_cast %183 : vector<1x1x128xbf16> to vector<1x128xbf16>
    %185 = arith.extf %184 : vector<1x128xbf16> to vector<1x128xf32>
    %186 = arith.mulf %185, %25 : vector<1x128xf32>
    %187 = arith.addf %182, %186 : vector<1x128xf32>
    %c0_92 = arith.constant 0 : index
    %c21 = arith.constant 21 : index
    %c0_93 = arith.constant 0 : index
    %188 = vector.load %arg5[%c0_92, %c21, %c0_93] : memref<1x36x128xbf16, #tpu.memory_space<vmem>>, vector<1x1x128xbf16>
    %189 = vector.shape_cast %188 : vector<1x1x128xbf16> to vector<1x128xbf16>
    %190 = arith.extf %189 : vector<1x128xbf16> to vector<1x128xf32>
    %191 = arith.mulf %190, %33 : vector<1x128xf32>
    %192 = arith.addf %187, %191 : vector<1x128xf32>
    %c0_94 = arith.constant 0 : index
    %c22 = arith.constant 22 : index
    %c0_95 = arith.constant 0 : index
    %193 = vector.load %arg5[%c0_94, %c22, %c0_95] : memref<1x36x128xbf16, #tpu.memory_space<vmem>>, vector<1x1x128xbf16>
    %194 = vector.shape_cast %193 : vector<1x1x128xbf16> to vector<1x128xbf16>
    %195 = arith.extf %194 : vector<1x128xbf16> to vector<1x128xf32>
    %196 = arith.mulf %195, %41 : vector<1x128xf32>
    %197 = arith.addf %192, %196 : vector<1x128xf32>
    %c0_96 = arith.constant 0 : index
    %c23 = arith.constant 23 : index
    %c0_97 = arith.constant 0 : index
    %198 = vector.load %arg5[%c0_96, %c23, %c0_97] : memref<1x36x128xbf16, #tpu.memory_space<vmem>>, vector<1x1x128xbf16>
    %199 = vector.shape_cast %198 : vector<1x1x128xbf16> to vector<1x128xbf16>
    %200 = arith.extf %199 : vector<1x128xbf16> to vector<1x128xf32>
    %201 = arith.mulf %200, %49 : vector<1x128xf32>
    %202 = arith.addf %197, %201 : vector<1x128xf32>
    %c0_98 = arith.constant 0 : index
    %c24 = arith.constant 24 : index
    %c0_99 = arith.constant 0 : index
    %203 = vector.load %arg5[%c0_98, %c24, %c0_99] : memref<1x36x128xbf16, #tpu.memory_space<vmem>>, vector<1x1x128xbf16>
    %204 = vector.shape_cast %203 : vector<1x1x128xbf16> to vector<1x128xbf16>
    %205 = arith.extf %204 : vector<1x128xbf16> to vector<1x128xf32>
    %206 = arith.mulf %205, %57 : vector<1x128xf32>
    %207 = arith.addf %202, %206 : vector<1x128xf32>
    %c0_100 = arith.constant 0 : index
    %c25 = arith.constant 25 : index
    %c0_101 = arith.constant 0 : index
    %208 = vector.load %arg5[%c0_100, %c25, %c0_101] : memref<1x36x128xbf16, #tpu.memory_space<vmem>>, vector<1x1x128xbf16>
    %209 = vector.shape_cast %208 : vector<1x1x128xbf16> to vector<1x128xbf16>
    %210 = arith.extf %209 : vector<1x128xbf16> to vector<1x128xf32>
    %211 = arith.mulf %210, %65 : vector<1x128xf32>
    %212 = arith.addf %207, %211 : vector<1x128xf32>
    %c0_102 = arith.constant 0 : index
    %c26 = arith.constant 26 : index
    %c0_103 = arith.constant 0 : index
    %213 = vector.load %arg5[%c0_102, %c26, %c0_103] : memref<1x36x128xbf16, #tpu.memory_space<vmem>>, vector<1x1x128xbf16>
    %214 = vector.shape_cast %213 : vector<1x1x128xbf16> to vector<1x128xbf16>
    %215 = arith.extf %214 : vector<1x128xbf16> to vector<1x128xf32>
    %216 = arith.mulf %215, %73 : vector<1x128xf32>
    %217 = arith.addf %212, %216 : vector<1x128xf32>
    %c0_104 = arith.constant 0 : index
    %c2_105 = arith.constant 2 : index
    %c0_106 = arith.constant 0 : index
    %218 = vector.load %arg7[%c0_104, %c2_105, %c0_106] : memref<1x4x128xf32, #tpu.memory_space<vmem>>, vector<1x1x128xf32>
    %219 = vector.shape_cast %218 : vector<1x1x128xf32> to vector<1x128xf32>
    %220 = arith.mulf %217, %219 : vector<1x128xf32>
    %c0_107 = arith.constant 0 : index
    %c2_108 = arith.constant 2 : index
    %c0_109 = arith.constant 0 : index
    %221 = vector.load %arg8[%c0_107, %c2_108, %c0_109] : memref<1x4x128xf32, #tpu.memory_space<vmem>>, vector<1x1x128xf32>
    %222 = vector.shape_cast %221 : vector<1x1x128xf32> to vector<1x128xf32>
    %223 = vector.shape_cast %220 : vector<1x128xf32> to vector<1x1x128xf32>
    tpu.vector_store %arg8[%c0_107, %c2_108, %c0_109], %223 {strides = array<i32>} : memref<1x4x128xf32, #tpu.memory_space<vmem>>, vector<1x1x128xf32>,
    %c0_110 = arith.constant 0 : index
    %c27 = arith.constant 27 : index
    %c0_111 = arith.constant 0 : index
    %224 = vector.load %arg5[%c0_110, %c27, %c0_111] : memref<1x36x128xbf16, #tpu.memory_space<vmem>>, vector<1x1x128xbf16>
    %225 = vector.shape_cast %224 : vector<1x1x128xbf16> to vector<1x128xbf16>
    %226 = arith.extf %225 : vector<1x128xbf16> to vector<1x128xf32>
    %227 = arith.mulf %226, %9 : vector<1x128xf32>
    %c0_112 = arith.constant 0 : index
    %c28 = arith.constant 28 : index
    %c0_113 = arith.constant 0 : index
    %228 = vector.load %arg5[%c0_112, %c28, %c0_113] : memref<1x36x128xbf16, #tpu.memory_space<vmem>>, vector<1x1x128xbf16>
    %229 = vector.shape_cast %228 : vector<1x1x128xbf16> to vector<1x128xbf16>
    %230 = arith.extf %229 : vector<1x128xbf16> to vector<1x128xf32>
    %231 = arith.mulf %230, %17 : vector<1x128xf32>
    %232 = arith.addf %227, %231 : vector<1x128xf32>
    %c0_114 = arith.constant 0 : index
    %c29 = arith.constant 29 : index
    %c0_115 = arith.constant 0 : index
    %233 = vector.load %arg5[%c0_114, %c29, %c0_115] : memref<1x36x128xbf16, #tpu.memory_space<vmem>>, vector<1x1x128xbf16>
    %234 = vector.shape_cast %233 : vector<1x1x128xbf16> to vector<1x128xbf16>
    %235 = arith.extf %234 : vector<1x128xbf16> to vector<1x128xf32>
    %236 = arith.mulf %235, %25 : vector<1x128xf32>
    %237 = arith.addf %232, %236 : vector<1x128xf32>
    %c0_116 = arith.constant 0 : index
    %c30 = arith.constant 30 : index
    %c0_117 = arith.constant 0 : index
    %238 = vector.load %arg5[%c0_116, %c30, %c0_117] : memref<1x36x128xbf16, #tpu.memory_space<vmem>>, vector<1x1x128xbf16>
    %239 = vector.shape_cast %238 : vector<1x1x128xbf16> to vector<1x128xbf16>
    %240 = arith.extf %239 : vector<1x128xbf16> to vector<1x128xf32>
    %241 = arith.mulf %240, %33 : vector<1x128xf32>
    %242 = arith.addf %237, %241 : vector<1x128xf32>
    %c0_118 = arith.constant 0 : index
    %c31 = arith.constant 31 : index
    %c0_119 = arith.constant 0 : index
    %243 = vector.load %arg5[%c0_118, %c31, %c0_119] : memref<1x36x128xbf16, #tpu.memory_space<vmem>>, vector<1x1x128xbf16>
    %244 = vector.shape_cast %243 : vector<1x1x128xbf16> to vector<1x128xbf16>
    %245 = arith.extf %244 : vector<1x128xbf16> to vector<1x128xf32>
    %246 = arith.mulf %245, %41 : vector<1x128xf32>
    %247 = arith.addf %242, %246 : vector<1x128xf32>
    %c0_120 = arith.constant 0 : index
    %c32 = arith.constant 32 : index
    %c0_121 = arith.constant 0 : index
    %248 = vector.load %arg5[%c0_120, %c32, %c0_121] : memref<1x36x128xbf16, #tpu.memory_space<vmem>>, vector<1x1x128xbf16>
    %249 = vector.shape_cast %248 : vector<1x1x128xbf16> to vector<1x128xbf16>
    %250 = arith.extf %249 : vector<1x128xbf16> to vector<1x128xf32>
    %251 = arith.mulf %250, %49 : vector<1x128xf32>
    %252 = arith.addf %247, %251 : vector<1x128xf32>
    %c0_122 = arith.constant 0 : index
    %c33 = arith.constant 33 : index
    %c0_123 = arith.constant 0 : index
    %253 = vector.load %arg5[%c0_122, %c33, %c0_123] : memref<1x36x128xbf16, #tpu.memory_space<vmem>>, vector<1x1x128xbf16>
    %254 = vector.shape_cast %253 : vector<1x1x128xbf16> to vector<1x128xbf16>
    %255 = arith.extf %254 : vector<1x128xbf16> to vector<1x128xf32>
    %256 = arith.mulf %255, %57 : vector<1x128xf32>
    %257 = arith.addf %252, %256 : vector<1x128xf32>
    %c0_124 = arith.constant 0 : index
    %c34 = arith.constant 34 : index
    %c0_125 = arith.constant 0 : index
    %258 = vector.load %arg5[%c0_124, %c34, %c0_125] : memref<1x36x128xbf16, #tpu.memory_space<vmem>>, vector<1x1x128xbf16>
    %259 = vector.shape_cast %258 : vector<1x1x128xbf16> to vector<1x128xbf16>
    %260 = arith.extf %259 : vector<1x128xbf16> to vector<1x128xf32>
    %261 = arith.mulf %260, %65 : vector<1x128xf32>
    %262 = arith.addf %257, %261 : vector<1x128xf32>
    %c0_126 = arith.constant 0 : index
    %c35 = arith.constant 35 : index
    %c0_127 = arith.constant 0 : index
    %263 = vector.load %arg5[%c0_126, %c35, %c0_127] : memref<1x36x128xbf16, #tpu.memory_space<vmem>>, vector<1x1x128xbf16>
    %264 = vector.shape_cast %263 : vector<1x1x128xbf16> to vector<1x128xbf16>
    %265 = arith.extf %264 : vector<1x128xbf16> to vector<1x128xf32>
    %266 = arith.mulf %265, %73 : vector<1x128xf32>
    %267 = arith.addf %262, %266 : vector<1x128xf32>
    %c0_128 = arith.constant 0 : index
    %c3_129 = arith.constant 3 : index
    %c0_130 = arith.constant 0 : index
    %268 = vector.load %arg7[%c0_128, %c3_129, %c0_130] : memref<1x4x128xf32, #tpu.memory_space<vmem>>, vector<1x1x128xf32>
    %269 = vector.shape_cast %268 : vector<1x1x128xf32> to vector<1x128xf32>
    %270 = arith.mulf %267, %269 : vector<1x128xf32>
    %c0_131 = arith.constant 0 : index
    %c3_132 = arith.constant 3 : index
    %c0_133 = arith.constant 0 : index
    %271 = vector.load %arg8[%c0_131, %c3_132, %c0_133] : memref<1x4x128xf32, #tpu.memory_space<vmem>>, vector<1x1x128xf32>
    %272 = vector.shape_cast %271 : vector<1x1x128xf32> to vector<1x128xf32>
    %273 = vector.shape_cast %270 : vector<1x128xf32> to vector<1x1x128xf32>
    tpu.vector_store %arg8[%c0_131, %c3_132, %c0_133], %273 {strides = array<i32>} : memref<1x4x128xf32, #tpu.memory_space<vmem>>, vector<1x1x128xf32>,
    return
  }
  func.func @transform_0(%arg0: i32, %arg1: i32) -> i32 {
    %c0_i32 = arith.constant 0 : i32
    %c0_i32_0 = arith.constant 0 : i32
    return %c0_i32 : i32
  }
  func.func @transform_1(%arg0: i32, %arg1: i32) -> i32 {
    %c0_i32 = arith.constant 0 : i32
    %c0_i32_0 = arith.constant 0 : i32
    return %c0_i32 : i32
  }
  func.func @transform_2(%arg0: i32, %arg1: i32) -> i32 {
    %c0_i32 = arith.constant 0 : i32
    %c0_i32_0 = arith.constant 0 : i32
    return %c0_i32 : i32
  }
  func.func @transform_3(%arg0: i32, %arg1: i32) -> (i32, i32, i32) {
    %c0_i32 = arith.constant 0 : i32
    %c0_i32_0 = arith.constant 0 : i32
    return %arg0, %c0_i32, %arg1 : i32, i32, i32
  }
  func.func @transform_4(%arg0: i32, %arg1: i32) -> (i32, i32, i32) {
    %c0_i32 = arith.constant 0 : i32
    %c0_i32_0 = arith.constant 0 : i32
    return %arg0, %c0_i32, %arg1 : i32, i32, i32
  }
  func.func @transform_5(%arg0: i32, %arg1: i32) -> (i32, i32, i32) {
    %c0_i32 = arith.constant 0 : i32
    %c0_i32_0 = arith.constant 0 : i32
    return %arg0, %c0_i32, %arg1 : i32, i32, i32
  }
  func.func @transform_6(%arg0: i32, %arg1: i32) -> (i32, i32, i32) {
    %c0_i32 = arith.constant 0 : i32
    %c0_i32_0 = arith.constant 0 : i32
    return %arg0, %c0_i32, %arg1 : i32, i32, i32
  }
}

</mosaic_0001>

<bundles_post_ra>
// kernel: tpu_custom_call.1
= control target key start
LH: loop header
LB: loop body
LE: loop exit
PB: predicated region body
PF: predicated region fallthrough
CT: control target
= control target key end

     0   :  { %s1606_s0 = inlined_call_operand.<no memory space> [shape: f32[1], index: 0, kind: input, shape index: {}]   ;;  %s1607_s1 = inlined_call_operand.<no memory space> [shape: f32[1], index: 1, kind: input, shape index: {}]   ;;  %s1608_s2 = inlined_call_operand.vmem [shape: f32[9], index: 2, kind: input, shape index: {}]   ;;  %s1609_s3 = inlined_call_operand.vmem [shape: bf16[2,36,256], index: 3, kind: input, shape index: {}]   ;;  %s1610_s4 = inlined_call_operand.vmem [shape: f32[2,9,256], index: 4, kind: input, shape index: {}]   ;;  %s1611_s5 = inlined_call_operand.vmem [shape: f32[2,4,256], index: 5, kind: input, shape index: {}]   ;;  %s1612_s6 = inlined_call_operand.hbm [shape: f32[2,4,256], index: 6, kind: output, shape index: {}]  }
   0x1   :  { %1614 = sst [smem:[#allocation12_spill]] %s1608_s2 }
   0x2   :  { %1615 = sst [smem:[#allocation13_spill]] %s1609_s3 }
   0x3   :  { %11 = sst [smem:[#allocation2]] %s1606_s0 }
   0x4   :  { %12 = sst [smem:[#allocation3]] %s1607_s1 }
   0x5   :  { %13 = vsyncpa [#allocation6], 0 }
   0x6   :  { %14 = vsyncpa [#allocation5], 0 }
   0x7   :  { %16 = vsyncpa [#allocation5 + $0x1], 0  ;;  %s1192_s25 = smov 0   ;;  %s1194_s26 = smov 0  }
   0x8   :  { %s1196_s27 = smov 0   ;;  %s1198_s28 = smov 0  }
   0x9   :  { %s1200_s29 = smov 0   ;;  %s1202_s30 = smov 0  }
   0xa   :  { %s1204_s0 = smov 0   ;;  %s1206_s7 = smov 0  }
   0xb LB: > { %s921_s1 = sadd.s32 4294967295, %s1147_s7   ;;  %s922_s8 = sadd.s32 4294967294, %s1147_s7   ;;  %s1147_s7 = sphi %s1206_s7, %s22_s7   ;;  %s1143_s0 = sphi %s1204_s0, %s1631_s0   ;;  %s1139_s30 = sphi %s1202_s30, %s1630_s30   ;;  %s1135_s29 = sphi %s1200_s29, %s1629_s29   ;;  %s1131_s28 = sphi %s1198_s28, %s1628_s28   ;;  %s1127_s27 = sphi %s1196_s27, %s1627_s27   ;;  %s1123_s26 = sphi %s1194_s26, %s1626_s26   ;;  %s1119_s25 = sphi %s1192_s25, %s1625_s25  }
   0xc   : > { %s31_s9 = sadd.s32 1, %s1139_s30  ;;  %s34_s10 = sadd.s32 1, %s1143_s0 }
   0xd   : > { %p32_p0 = scmp.ge.s32.totalorder %s31_s9, 2  ;;  %s106_s11 = sadd.s32 1, %s1127_s27 }
   0xe   : > { %p113_p1 = scmp.ne.s32.totalorder %s1127_s27, %s1123_s26  ;;  %p114_p2 = scmp.eq.s32.totalorder %s1147_s7, 0 }
   0xf   : > { %s1633_s9 = smov (%p32_p0, %s31_s9), 0  ;;  %s1635_s10 = smov (!%p32_p0, %s34_s10), %s1143_s0 }
  0x10   : > { %s102_s12 = ssub.s32 %s1139_s30, %s1633_s9  ;;  %p1245_p3 = por %p114_p2, %p113_p1 }
  0x11   : > { %p36_p4 = scmp.ge.s32.totalorder %s1635_s10, 2  ;;  %p201_p5 = scmp.eq.s32.totalorder %s921_s1, 3 }
  0x12   : > { %p206_p6 = scmp.ne.s32.totalorder %s1123_s26, %s1119_s25  ;;  %p207_p7 = scmp.eq.s32.totalorder %s922_s8, 3 }
  0x13   : > { %s1637_s10 = smov (%p36_p4, %s1635_s10), 0  ;;  %p1253_p8 = por %p201_p5, %p113_p1 }
  0x14   : > { %p1257_p9 = por %p207_p7, %p206_p6  ;;  %s101_s16 = ssub.s32 %s1143_s0, %s1637_s10 }
  0x15   : > { %s1617_s14 = scalar_select %p1253_p8, 1, 0 }
  0x16   : > { %s1618_s15 = scalar_select %p1257_p9, 1, 0 }
  0x17   : > { %p923_p10 = scmp.ge.s32.totalorder %s1147_s7, 1  ;;  %s103_s17 = sor.u32 %s102_s12, %s101_s16 }
  0x18   : > { %p214_p11 = scmp.lt.s32.totalorder %s1147_s7, 5  ;;  %p104_p12 = scmp.eq.s32.totalorder %s103_s17, 0 }
  0x19   : > { %p1269_p0 = scmp.eq.s32.totalorder %s921_s1, 0  ;;  %s1621_s2 = sld [smem:[#allocation12_spill]] }
  0x1a   : > { %p1265_p13 = pnand %p923_p10, %p214_p11 }
  0x1b   : > { %s1274_s20 = scalar_select %p104_p12, %s1127_s27, %s106_s11  }
  0x1c   : > { %p958_p1 = pneg %p1265_p13 }
  0x1e   : > { %p959_p2 = pnand %p1269_p0, %p958_p1 }
  0x1f   : > { %s233_s23 = sshll.u32 %s1621_s2, 4  ;;  %s234_s23 = int_to_ptr.vmem [resolvable:$true] %s233_s23 }
  0x20   : > { %s1034_s24 = scalar_lea.vmem %s234_s23, 16  ;;  %p1036_p5 = pneg %p959_p2 }
  0x21   : > { %p1035_p4 = scmp.ne.s32.totalorder %s234_s23, %s1034_s24  ;;  %p1042_p10 = scmp.lt.s32.totalorder %s234_s23, %s234_s23 }
  0x22   : > { %p1043_p11 = scmp.lt.s32.totalorder %s1034_s24, %s1034_s24 }
  0x23   : > { %p1037_p6 = pnand %p1036_p5, %p1035_p4 }
  0x24   : > { %p1044_p9 = por %p1043_p11, %p1042_p10 }
  0x25   : > { %p1038_p7 = pneg %p1037_p6 }
  0x27   : > { %p1045_p8 = pnand %p1044_p9, %p1038_p7 }
  0x29   : > { %1048 = shalt.err (!%p1045_p8)
}
  0x2a   : > { %s1149_s1 = smov [#allocation4]   ;;  %p925_p12 = scmp.ge.s32.totalorder %s1147_s7, 4 }
  0x2b   : > { %961 = dma.vmem_to_smem (!%p959_p2), %s234_s23, 16, %s1149_s1, [#allocation6]  }
  0x2c   : > { %240 = sbr.rel (%p925_p12) target bundleno = 70 (0x46), region = 28 }
  0x33   : > { %243 = sbr.rel (!%p1245_p3) target bundleno = 63 (0x3f), region = 32  ;;  %s245_s8 = sand.u32 (%p1245_p3), 1, %s1127_s27  }
  0x34   : > { %s950_s11 = smul.u32 (%p1245_p3), 10, %s1143_s0  ;;  %s1622_s3 = sld [smem:[#allocation13_spill]] (%p1245_p3) }
  0x35   : > { %s949_s12 = smul.u32 (%p1245_p3), 20, %s245_s8 }
  0x36   : > { %s249_s16 = sadd.s32 (%p1245_p3), %s1139_s30, %s950_s11 }
  0x37   : > { %s926_s17 = sshll.u32 (%p1245_p3), %s249_s16, 2  ;;  %s247_s23 = scalar_lea.vmem (%p1245_p3), [#allocation7], %s949_s12 }
  0x3a   : > { %s251_s24 = scalar_lea.vmem %s1622_s3, %s926_s17 }
  0x3b   : > { %v267_v0 = vld [vmem:[%s251_s24] sm:$0xf]  ;;  %v269_v1 = vld [vmem:[%s251_s24 + $0x8] sm:$0xf]  ;;  %v271_v2 = vld [vmem:[%s251_s24 + $0x10] sm:$0xf] }
  0x3c   : > { %268 = vst [vmem:[%s247_s23] sm:$0xf] %v267_v0  ;;  %270 = vst [vmem:[%s247_s23 + $0x4] sm:$0xf] %v269_v1  ;;  %v273_v3 = vld [vmem:[%s251_s24 + $0x18] sm:$0xf] }
  0x3d   : > { %272 = vst [vmem:[%s247_s23 + $0x8] sm:$0xf] %v271_v2  ;;  %v275_v4 = vld [vmem:[%s251_s24 + $0x20] sm:$0xf]  ;;  %274 = vst [vmem:[%s247_s23 + $0xc] sm:$0xf] %v273_v3 }
  0x3e   : > { %276 = vst [vmem:[%s247_s23 + $0x10] sm:$0xf] %v275_v4 }
  0x3f PF: > { %309 = sbr.rel (!%p1245_p3) target bundleno = 70 (0x46), region = 73  ;;  %s311_s1 = sand.u32 (%p1245_p3), 1, %s1127_s27  }
  0x40   : > { %s928_s8 = sshll.u32 (%p1245_p3), %s1143_s0, 2  ;;  %s927_s11 = sshll.u32 (%p1245_p3), %s311_s1, 4 }
  0x41   : > { %s315_s16 = sadd.s32 (%p1245_p3), %s1139_s30, %s928_s8  ;;  %s313_s24 = scalar_lea.vmem (%p1245_p3), [#allocation8], %s927_s11 }
  0x42   : > { %s929_s17 = sshll.u32 (%p1245_p3), %s315_s16, 3 }
  0x43   : > { %s317_s22 = scalar_lea.vmem (%p1245_p3), %s1610_s4, %s929_s17 }
  0x44   : > { %v347_v5 = vld [vmem:[%s317_s22] sm:$0xff] (%p1245_p3)  ;;  %v349_v6 = vld [vmem:[%s317_s22 + $0x10] sm:$0xff] (%p1245_p3) }
  0x45   : > { %348 = vst [vmem:[%s313_s24] sm:$0xff] (%p1245_p3), %v347_v5  ;;  %350 = vst [vmem:[%s313_s24 + $0x8] sm:$0xff] (%p1245_p3), %v349_v6 }
  0x46 PF: > { %370 = sbr.rel (%p1265_p13) target bundleno = 162 (0xa2), region = 115 }
  0x4d   : > { %1110 = dma.done.wait (%p1269_p0), [#allocation6], 16  }
  0x4e   : > { %1112 = vsyncadd (%p1269_p0), [#allocation6], 4294967280  ;;  %s1307_s13 = sand.u32 1, %s1123_s26  }
  0x4f   : > { %s951_s23 = smul.u32 20, %s1307_s13  ;;  %s932_s1 = sshll.u32 %s1307_s13, 4 }
  0x50   : > { %s386_s11 = scalar_lea.vmem [#allocation8], %s932_s1 }
  0x51   : > { %s1311_s8 = scalar_lea.vmem [#allocation7], %s951_s23 }
  0x52   : > { %390 = sfence }
  0x53   : > { %p426_p3 = scmp.lt.s32.totalorder %s1135_s29, 1  ;;  %p428_p8 = scmp.lt.s32.totalorder %s1131_s28, 1  ;;  %v1320_v7 = vld [vmem:[%s1311_s8] sm:$0x1]  ;;  %v436_v8 = vld [vmem:[%s386_s11] sm:$0x1] }
  0x54   : > { %s434_s17 = sld [smem:[#allocation2]]  ;;  %s1322_s24 = sld [smem:[#allocation4]]  ;;  %v443_v9 = vld [vmem:[%s386_s11 + $0x1] sm:$0x1]  ;;  %v1325_v10 = vld [vmem:[%s1311_s8] sm:$0x2]  ;;  %v492_v21 = vunpack.c.l.bf16 %v1320_v7 }
  0x55   : > { %s427_s18 = scalar_select %p426_p3, %s1135_s29, 1  ;;  %v449_v11 = vld [vmem:[%s386_s11 + $0x2] sm:$0x1]  ;;  %v455_v12 = vld [vmem:[%s386_s11 + $0x3] sm:$0x1]  ;;  %v503_v24 = vunpack.c.l.bf16 %v1325_v10 }
  0x56   : > { %s429_s19 = scalar_select %p428_p8, %s1131_s28, 1  ;;  %v461_v13 = vld [vmem:[%s386_s11 + $0x4] sm:$0x1]  ;;  %v467_v14 = vld [vmem:[%s386_s11 + $0x5] sm:$0x1] }
  0x57   : > { %s934_s16 = sshll.u32 %s427_s18, 1  ;;  %s1317_s21 = sld [smem:[#allocation3]]  ;;  %v1335_v15 = vld [vmem:[%s1311_s8] sm:$0x4]  ;;  %v1338_v16 = vld [vmem:[%s1311_s8] sm:$0x8] }
  0x58   : > { %s431_s12 = sadd.s32 %s934_s16, %s429_s19  ;;  %s1332_s2 = sld [smem:[#allocation4 + $0x1]]  ;;  %v473_v17 = vld [vmem:[%s386_s11 + $0x6] sm:$0x1]  ;;  %v479_v18 = vld [vmem:[%s386_s11 + $0x7] sm:$0x1]  ;;  %v521_v25 = vunpack.c.l.bf16 %v1335_v15  ;;  %v539_v26 = vunpack.c.l.bf16 %v1338_v16 }
  0x59   : > { %s935_s22 = sshll.u32 %s431_s12, 2  ;;  %s1340_s19 = sld [smem:[#allocation4 + $0x2]]  ;;  %v485_v19 = vld [vmem:[%s386_s11 + $0x8] sm:$0x1]  ;;  %v1345_v20 = vld [vmem:[%s1311_s8 + $0x4] sm:$0x1] }
  0x5a   : > { %s1330_s18 = scalar_lea.vmem %s1611_s5, %s935_s22  ;;  %s1342_s16 = sld [smem:[#allocation4 + $0x3]]  ;;  %v1353_v22 = vld [vmem:[%s1311_s8 + $0x4] sm:$0x1]  ;;  %v437_v23 = vstv %s434_s17  ;;  %v1363_v27 = vld [vmem:[%s1311_s8 + $0x4] sm:$0x2]  ;;  %v557_v30 = vunpack.c.l.bf16 %v1345_v20 }
  0x5b   : > { %s1347_s12 = sld [smem:[#allocation4 + $0x4]]  ;;  %s1349_s22 = sld [smem:[#allocation4 + $0x5]]  ;;  %v438_v28 = vmul.f32 %v437_v23, %v436_v8  ;;  %v444_v29 = vmul.f32 %v443_v9, %v437_v23  ;;  %v564_v31 = vunpack.c.l.bf16 %v1353_v22  ;;  %v1370_v32 = vld [vmem:[%s1311_s8 + $0x4] sm:$0x4]  ;;  %v1373_v33 = vld [vmem:[%s1311_s8 + $0x4] sm:$0x8]  ;;  %v450_v34 = vmul.f32 %v449_v11, %v437_v23 }
  0x5c   : > { %s1355_s23 = sld [smem:[#allocation4 + $0x6]]  ;;  %s1357_s1 = sld [smem:[#allocation4 + $0x7]]  ;;  %v456_v35 = vmul.f32 %v455_v12, %v437_v23  ;;  %v462_v36 = vmul.f32 %v461_v13, %v437_v23  ;;  %v468_v37 = vmul.f32 %v467_v14, %v437_v23  ;;  %v1378_v38 = vld [vmem:[%s1311_s8 + $0x8] sm:$0x1]  ;;  %v1381_v39 = vld [vmem:[%s1330_s18 + $0x1] sm:$0x1]  ;;  %v474_v41 = vmul.f32 %v473_v17, %v437_v23 }
  0x5d   : > { %s1365_s11 = sld [smem:[#allocation4 + $0x8]]  ;;  %s440_s17 = smul.f32 %s1322_s24, %s1317_s21  ;;  %v1384_v40 = vld [vmem:[%s1311_s8 + $0x8] sm:$0x2]  ;;  %v480_v42 = vmul.f32 %v479_v18, %v437_v23  ;;  %v486_v43 = vmul.f32 %v485_v19, %v437_v23  ;;  %v570_v44 = vunpack.c.l.bf16 %v1363_v27  ;;  %v1390_v45 = vld [vmem:[%s1311_s8 + $0x8] sm:$0x4]  ;;  %v586_v48 = vunpack.c.l.bf16 %v1370_v32 }
  0x5e   : > { %s446_s3 = smul.f32 %s1332_s2, %s1317_s21  ;;  %v1393_v46 = vld [vmem:[%s1311_s8 + $0x8] sm:$0x8]  ;;  %v602_v49 = vunpack.c.l.bf16 %v1373_v33  ;;  %v618_v50 = vunpack.c.l.bf16 %v1378_v38  ;;  %v1401_v51 = vld [vmem:[%s1311_s8 + $0xc] sm:$0x1]  ;;  %v631_v54 = vrot.slane %v1381_v39, 7  ;;  %v636_v55 = vunpack.c.l.bf16 %v1384_v40  ;;  %p1623_p13 = scmp.ne.s32.totalorder %s1617_s14, 0 }
  0x5f   : > { %v441_v47 = vstv %s440_s17  ;;  %s452_s24 = smul.f32 %s1340_s19, %s1317_s21  ;;  %v648_v58 = vunpack.c.l.bf16 %v1390_v45  ;;  %v664_v59 = vunpack.c.l.bf16 %v1393_v46  ;;  %v680_v63 = vunpack.c.l.bf16 %v1401_v51 }
  0x60   : > { %v1403_v52 = vadd.f32 %v441_v47, %v438_v28  ;;  %v447_v53 = vstv %s446_s3  ;;  %s458_s2 = smul.f32 %s1342_s16, %s1317_s21 }
  0x61   : > { %v1409_v56 = vadd.f32 %v447_v53, %v444_v29  ;;  %v453_v57 = vstv %s452_s24  ;;  %s464_s19 = smul.f32 %s1347_s12, %s1317_s21 }
  0x62   : > { %v1415_v60 = vadd.f32 %v453_v57, %v450_v34  ;;  %v459_v61 = vstv %s458_s2  ;;  %s470_s3 = smul.f32 %s1349_s22, %s1317_s21  ;;  %v493_v62 = vmul.f32 %v492_v21, %v1403_v52  ;;  %v566_v3 = vrot.slane %v1403_v52, 7 }
  0x63   : > { %v1423_v0 = vadd.f32 %v459_v61, %v456_v35  ;;  %v465_v1 = vstv %s464_s19  ;;  %s476_s16 = smul.f32 %s1355_s23, %s1317_s21  ;;  %v495_v2 = vrot.slane %v1409_v56, 7  ;;  %v571_v8 = vrot.slane %v1409_v56, 6 }
  0x64   : > { %v1429_v4 = vadd.f32 %v465_v1, %v462_v36  ;;  %v471_v5 = vstv %s470_s3  ;;  %s482_s12 = smul.f32 %s1357_s1, %s1317_s21  ;;  %v505_v6 = vrot.slane %v1415_v60, 6  ;;  %v568_v10 = vmul.f32 %v566_v3, %v564_v31 }
  0x65   : > { %v1435_v9 = vadd.f32 %v471_v5, %v468_v37  ;;  %v477_v11 = vstv %s476_s16  ;;  %s488_s22 = smul.f32 %s1365_s11, %s1317_s21  ;;  %v497_v12 = vmul.f32 %v495_v2, %v492_v21  ;;  %v513_v13 = vrot.slane %v1423_v0, 5  ;;  %s933_s21 = sshll.u32 %s1307_s13, 2 }
  0x66   : > { %v1442_v14 = vadd.f32 %v477_v11, %v474_v41  ;;  %v483_v17 = vstv %s482_s12  ;;  %v507_v18 = vmul.f32 %v505_v6, %v503_v24  ;;  %v523_v19 = vrot.slane %v1429_v4, 4  ;;  %s1522_s23 = scalar_lea.vmem [#allocation9], %s933_s21 }
  0x67   : > { %v1447_v23 = vadd.f32 %v483_v17, %v480_v42  ;;  %v489_v28 = vstv %s488_s22  ;;  %v499_v29 = vrot.slane %v497_v12, 1  ;;  %v515_v34 = vmul.f32 %v513_v13, %v503_v24  ;;  %s791_s17 = sshll.u32 %s1522_s23, 4  ;;  %s1553_s17 = int_to_ptr.vmem [resolvable:$true] %s791_s17 }
  0x68   : > { %v1451_v35 = vadd.f32 %v489_v28, %v486_v43  ;;  %v509_v7 = vrot.slane %v507_v18, 2  ;;  %v525_v21 = vmul.f32 %v523_v19, %v521_v25  ;;  %v531_v36 = vrot.slane %v1435_v9, 3  ;;  %s1049_s19 = scalar_lea.vmem %s1553_s17, 64 }
  0x69   : > { %v501_v37 = vadd.f32 %v499_v29, %v493_v62  ;;  %v517_v41 = vrot.slane %v515_v34, 3  ;;  %v541_v47 = vrot.slane %v1442_v14, 2  ;;  %v549_v42 = vrot.slane %v1447_v23, 1  ;;  %p1050_p9 = scmp.ne.s32.totalorder %s1553_s17, %s1049_s19 }
  0x6a   : > { %v527_v53 = vrot.slane %v525_v21, 4  ;;  %v533_v57 = vmul.f32 %v531_v36, %v521_v25  ;;  %v573_v24 = vmul.f32 %v571_v8, %v570_v44  ;;  %v558_v62 = vmul.f32 %v557_v30, %v1451_v35 }
  0x6b   : > { %v511_v43 = vadd.f32 %v509_v7, %v501_v37  ;;  %v543_v61 = vmul.f32 %v541_v47, %v539_v26  ;;  %v578_v1 = vrot.slane %v1415_v60, 5  ;;  %v551_v15 = vmul.f32 %v549_v42, %v539_v26  ;;  %p1051_p0 = pnand %p1050_p9, %p1623_p13 }
  0x6c   : > { %v575_v25 = vrot.slane %v573_v24, 1  ;;  %v587_v22 = vrot.slane %v1423_v0, 4  ;;  %v594_v31 = vrot.slane %v1429_v4, 3  ;;  %v535_v3 = vrot.slane %v533_v57, 5 }
  0x6d   : > { %v519_v2 = vadd.f32 %v517_v41, %v511_v43  ;;  %v545_v5 = vrot.slane %v543_v61, 6  ;;  %v580_v6 = vmul.f32 %v578_v1, %v570_v44  ;;  %v603_v16 = vrot.slane %v1435_v9, 2  ;;  %v693_v61 = vld [vmem:[%s1311_s8 + $0xc] sm:$0x2]  ;;  %v560_v1 = vld [vmem:[%s1330_s18] sm:$0x1]  ;;  %p1052_p1 = pneg %p1051_p0 }
  0x6e   : > { %v577_v8 = vadd.f32 %v575_v25, %v568_v10  ;;  %v589_v20 = vmul.f32 %v587_v22, %v586_v48  ;;  %v596_v30 = vmul.f32 %v594_v31, %v586_v48  ;;  %v610_v12 = vrot.slane %v1442_v14, 1 }
  0x6f   : > { %v529_v26 = vadd.f32 %v527_v53, %v519_v2  ;;  %v582_v11 = vrot.slane %v580_v6, 2  ;;  %v619_v13 = vmul.f32 %v618_v50, %v1447_v23  ;;  %v553_v17 = vrot.slane %v551_v15, 7 }
  0x70   : > { %v591_v27 = vrot.slane %v589_v20, 3  ;;  %v598_v44 = vrot.slane %v596_v30, 4  ;;  %v605_v18 = vmul.f32 %v603_v16, %v602_v49  ;;  %v612_v48 = vmul.f32 %v610_v12, %v602_v49  ;;  %v710_v20 = vld [vmem:[%s1311_s8 + $0xc] sm:$0x4] }
  0x71   : > { %v537_v19 = vadd.f32 %v535_v3, %v529_v26  ;;  %v584_v32 = vadd.f32 %v582_v11, %v577_v8  ;;  %v625_v28 = vrot.slane %v1451_v35, 7  ;;  %v621_v34 = vrot.slane %v619_v13, 7 }
  0x72   : > { %v607_v29 = vrot.slane %v605_v18, 5  ;;  %v637_v7 = vrot.slane %v1403_v52, 6  ;;  %v640_v21 = vrot.slane %v1409_v56, 5  ;;  %v614_v41 = vrot.slane %v612_v48, 6  ;;  %v742_v48 = vld [vmem:[%s1311_s8 + $0x10] sm:$0x1] }
  0x73   : > { %v547_v36 = vadd.f32 %v545_v5, %v537_v19  ;;  %v593_v37 = vadd.f32 %v591_v27, %v584_v32  ;;  %v649_v47 = vrot.slane %v1415_v60, 4  ;;  %v656_v49 = vrot.slane %v1423_v0, 3  ;;  %v705_v5 = vld [vmem:[%s1311_s8 + $0xc] sm:$0x2] }
  0x74   : > { %v639_v42 = vmul.f32 %v637_v7, %v636_v55  ;;  %v642_v33 = vmul.f32 %v640_v21, %v636_v55  ;;  %v665_v53 = vrot.slane %v1429_v4, 2  ;;  %v672_v43 = vrot.slane %v1435_v9, 1 }
  0x75   : > { %v555_v57 = vadd.f32 %v553_v17, %v547_v36  ;;  %v600_v10 = vadd.f32 %v598_v44, %v593_v37  ;;  %v651_v24 = vmul.f32 %v649_v47, %v648_v58  ;;  %v658_v40 = vmul.f32 %v656_v49, %v648_v58  ;;  %v756_v36 = vld [vmem:[%s1311_s8 + $0x10] sm:$0x2] }
  0x76   : > { %v644_v15 = vrot.slane %v642_v33, 1  ;;  %v667_v55 = vmul.f32 %v665_v53, %v664_v59  ;;  %v681_v25 = vmul.f32 %v680_v63, %v1442_v14  ;;  %v674_v3 = vmul.f32 %v672_v43, %v664_v59  ;;  %v726_v59 = vld [vmem:[%s1311_s8 + $0xc] sm:$0x8]  ;;  %s945_s8 = sshll.u32 %s1135_s29, 1 }
  0x77   : > { %v559_v22 = vadd.f32 %v558_v62, %v555_v57  ;;  %v609_v31 = vadd.f32 %v607_v29, %v600_v10  ;;  %v653_v2 = vrot.slane %v651_v24, 2  ;;  %v627_v45 = vmul.f32 %v625_v28, %v618_v50  ;;  %s787_s1 = sadd.s32 %s1131_s28, %s945_s8  ;;  %s1150_s28 = smov [#allocation9]  }
  0x78   : > { %v646_v58 = vadd.f32 %v644_v15, %v639_v42  ;;  %v660_v6 = vrot.slane %v658_v40, 3  ;;  %v694_v8 = vunpack.c.l.bf16 %v693_v61  ;;  %v669_v26 = vrot.slane %v667_v55, 4  ;;  %v699_v42 = vld [vmem:[%s1330_s18 + $0x2] sm:$0x1]  ;;  %s946_s11 = sshll.u32 %s787_s1, 6  ;;  %s1053_s3 = sshll.u32 %s1150_s28, 4  ;;  %s1054_s3 = int_to_ptr.vmem [resolvable:$false] %s1053_s3 }
  0x79   : > { %v561_v30 = vmul.f32 %v560_v1, %v559_v22  ;;  %v616_v16 = vadd.f32 %v614_v41, %v609_v31  ;;  %v686_v62 = vrot.slane %v1447_v23, 7  ;;  %v676_v12 = vrot.slane %v674_v3, 5  ;;  %s1551_s29 = scalar_lea.hbm %s1612_s6, %s946_s11  ;;  %s1055_s16 = scalar_lea.vmem %s1054_s3, 128 }
  0x7a   : > { %v655_v11 = vadd.f32 %v653_v2, %v646_v58  ;;  %v683_v46 = vrot.slane %v681_v25, 6  ;;  %v706_v13 = vunpack.c.l.bf16 %v705_v5  ;;  %v707_v17 = vrot.slane %v1403_v52, 5  ;;  %v769_v58 = vld [vmem:[%s1330_s18 + $0x3] sm:$0x1]  ;;  %s776_s18 = scalar_lea.sflag [#allocation5], %s1307_s13  ;;  %p1056_p2 = scmp.lt.s32.totalorder %s1553_s17, %s1054_s3 }
  0x7b   : > { %562 = vst [vmem:[%s1522_s23] sm:$0x1] %v561_v30  ;;  %v623_v38 = vadd.f32 %v621_v34, %v616_v16  ;;  %v688_v50 = vmul.f32 %v686_v62, %v680_v63  ;;  %v711_v27 = vunpack.c.l.bf16 %v710_v20  ;;  %v695_v18 = vrot.slane %v1451_v35, 6  ;;  %p1057_p4 = scmp.lt.s32.totalorder %s1055_s16, %s1049_s19 }
  0x7c   : > { %v662_v44 = vadd.f32 %v660_v6, %v655_v11  ;;  %v712_v19 = vrot.slane %v1409_v56, 4  ;;  %v719_v32 = vrot.slane %v1415_v60, 3  ;;  %v709_v7 = vmul.f32 %v707_v17, %v706_v13 }
  0x7d   : > { %v628_v28 = vadd.f32 %v627_v45, %v623_v38  ;;  %v690_v29 = vrot.slane %v688_v50, 7  ;;  %v727_v34 = vunpack.c.l.bf16 %v726_v59  ;;  %v728_v52 = vrot.slane %v1423_v0, 2  ;;  %p1058_p5 = por %p1057_p4, %p1056_p2 }
  0x7e   : > { %v671_v51 = vadd.f32 %v669_v26, %v662_v44  ;;  %v714_v63 = vmul.f32 %v712_v19, %v711_v27  ;;  %v721_v21 = vmul.f32 %v719_v32, %v711_v27  ;;  %v735_v56 = vrot.slane %v1429_v4, 1 }
  0x7f   : > { %v633_v37 = vmul.f32 %v631_v54, %v628_v28  ;;  %v743_v41 = vunpack.c.l.bf16 %v742_v48  ;;  %v749_v60 = vrot.slane %v1442_v14, 7  ;;  %v730_v53 = vmul.f32 %v728_v52, %v727_v34  ;;  %p1059_p6 = pnand %p1058_p5, %p1052_p1 }
  0x80   : > { %v678_v47 = vadd.f32 %v676_v12, %v671_v51  ;;  %v716_v33 = vrot.slane %v714_v63, 1  ;;  %v723_v49 = vrot.slane %v721_v21, 2  ;;  %v697_v57 = vmul.f32 %v695_v18, %v694_v8 }
  0x81   : > { %634 = vst [vmem:[%s1522_s23] sm:$0x2] %v633_v37  ;;  %v737_v10 = vmul.f32 %v735_v56, %v727_v34  ;;  %v744_v24 = vmul.f32 %v743_v41, %v1435_v9  ;;  %v757_v0 = vunpack.c.l.bf16 %v756_v36  ;;  %v732_v39 = vrot.slane %v730_v53, 3 }
  0x82   : > { %v685_v43 = vadd.f32 %v683_v46, %v678_v47  ;;  %v718_v61 = vadd.f32 %v716_v33, %v709_v7  ;;  %v758_v54 = vrot.slane %v1447_v23, 6  ;;  %v701_v4 = vrot.slane %v699_v42, 6 }
  0x83   : > { %v739_v15 = vrot.slane %v737_v10, 4  ;;  %v751_v40 = vmul.f32 %v749_v60, %v743_v41  ;;  %v746_v22 = vrot.slane %v744_v24, 5  ;;  %v765_v5 = vrot.slane %v1451_v35, 5 }
  0x84   : > { %v692_v14 = vadd.f32 %v690_v29, %v685_v43  ;;  %v725_v1 = vadd.f32 %v723_v49, %v718_v61  ;;  %v760_v31 = vmul.f32 %v758_v54, %v757_v0  ;;  %v771_v30 = vrot.slane %v769_v58, 5 }
  0x85   : > { %v753_v3 = vrot.slane %v751_v40, 6  ;;  %v767_v8 = vmul.f32 %v765_v5, %v757_v0 }
  0x86   : > { %v698_v55 = vadd.f32 %v697_v57, %v692_v14  ;;  %v734_v25 = vadd.f32 %v732_v39, %v725_v1  ;;  %v762_v45 = vrot.slane %v760_v31, 7 }
  0x88   : > { %v703_v9 = vmul.f32 %v701_v4, %v698_v55  ;;  %v741_v2 = vadd.f32 %v739_v15, %v734_v25 }
  0x8a   : > { %704 = vst [vmem:[%s1522_s23] sm:$0x4] %v703_v9  ;;  %v748_v23 = vadd.f32 %v746_v22, %v741_v2 }
  0x8c   : > { %v755_v6 = vadd.f32 %v753_v3, %v748_v23 }
  0x8e   : > { %v764_v20 = vadd.f32 %v762_v45, %v755_v6 }
  0x90   : > { %v768_v16 = vadd.f32 %v767_v8, %v764_v20 }
  0x92   : > { %v773_v26 = vmul.f32 %v771_v30, %v768_v16 }
  0x94   : > { %774 = vst [vmem:[%s1522_s23] sm:$0x8] %v773_v26 }
  0x95   : > { %1062 = shalt.err (!%p1059_p6)
}
  0x96   : > { %s1063_s13 = scalar_lea.hbm %s1551_s29, 64  ;;  %s1067_s21 = scalar_lea.hbm %s1612_s6, 256 }
  0x97   : > { %p1064_p7 = scmp.ne.s32.totalorder %s1551_s29, %s1063_s13  ;;  %p1068_p12 = scmp.lt.u32.totalorder %s1551_s29, %s1612_s6 }
  0x98   : > { %p1069_p3 = scmp.lt.u32.totalorder %s1067_s21, %s1063_s13  ;;  %p1071_p9 = scmp.lt.u32.totalorder %s1063_s13, %s1551_s29 }
  0x99   : > { %p1065_p10 = pnand %p1064_p7, %p1623_p13 }
  0x9a   : > { %p1070_p8 = por %p1069_p3, %p1068_p12 }
  0x9b   : > { %p1066_p11 = pneg %p1065_p10 }
  0x9c   : > { %p1072_p0 = por %p1071_p9, %p1070_p8 }
  0x9e   : > { %p1073_p1 = pnand %p1072_p0, %p1066_p11 }
  0xa0   : > { %1076 = shalt.err (!%p1073_p1)
}
  0xa1   : > { %956 = dma.vmem_to_hbm [thread:$0]  (%p1623_p13), %s1553_s17, 64, %s1551_s29, %s776_s18  }
  0xa2 PF: > { %p968_p2 = scmp.ge.s32.totalorder %s1147_s7, 2  ;;  %s803_s1 = sand.u32 1, %s1119_s25  }
  0xa3   : > { %p1624_p4 = scmp.ne.s32.totalorder %s1618_s15, 0  ;;  %s804_s11 = scalar_lea.sflag [#allocation5], %s803_s1 }
  0xa5   : > { %p963_p5 = pnand %p968_p2, %p1624_p4 }
  0xa7   : > { %1114 = dma.done.wait (!%p963_p5), %s804_s11, 64  }
  0xa8   : > { %1116 = vsyncadd (!%p963_p5), %s804_s11, 4294967232  ;;  %s22_s7 = sadd.s32 1, %s1147_s7   ;;  %s1625_s25 = smov %s1123_s26 }
  0xa9   : > { %p19_p6 = scmp.ge.s32.totalorder %s22_s7, 6   ;;  %s1626_s26 = smov %s1127_s27 }
  0xaa   : > { %s1627_s27 = smov %s1274_s20  ;;  %s1628_s28 = smov %s1139_s30 }
  0xab   : > { %s1629_s29 = smov %s1143_s0  ;;  %s1630_s30 = smov %s1633_s9 }
  0xac   : > { %s1631_s0 = smov %s1637_s10  ;;  %21 = sbr.rel (!%p19_p6) target bundleno = 11 (0xb), region = 179 }
  0xb3   :  { %809 = vsyncpa [#allocation5], 1 }
  0xb4   :  { %811 = vsyncpa [#allocation5 + $0x1], 1 }
  0xb5   :  { %812 = vsyncpa [#allocation6], 1 }
  0xb6   :  { %814 = vsyncpa [#allocation6 + $0x1], 1 }

</bundles_post_ra>
